<compile_context>
chip_gen: v5e
topology: v5e:2x2
jax: 0.10.0
libtpu: 0.0.40
codegen_flags: <defaults>
</compile_context>

<pallas_src>
import functools
import math

import jax
import jax.numpy as jnp
from jax.experimental import pallas as pl
from jax.experimental.pallas import tpu as pltpu


def _round_up(x, m):
    return ((x + m - 1) // m) * m


# ----------------------------------------------------------------------------
# Stage 1: fused projection  out = x @ w + bias   (rows = flattened B * N)
# ----------------------------------------------------------------------------
def _projection_kernel(x_ref, w_ref, b_ref, out_ref):
    acc = jnp.dot(x_ref[...], w_ref[...], preferred_element_type=jnp.float32)
    out_ref[...] = (acc + b_ref[...]).astype(out_ref.dtype)


def _project(x2d, w, bias2d, *, operand_dtype, out_dtype, row_tile=512):
    rows, f = x2d.shape
    h = w.shape[1]
    rt = min(_round_up(rows, 8), row_tile)          # sublane-full row tile
    rows_p = _round_up(rows, rt)
    if rows_p != rows:
        x2d = jnp.pad(x2d, ((0, rows_p - rows), (0, 0)))

    out = pl.pallas_call(
        _projection_kernel,
        out_shape=jax.ShapeDtypeStruct((rows_p, h), out_dtype),
        grid_spec=pltpu.PrefetchScalarGridSpec(
            num_scalar_prefetch=0,
            grid=(rows_p // rt,),
            in_specs=[
                pl.BlockSpec((rt, f), lambda i: (i, 0)),
                pl.BlockSpec((f, h), lambda i: (0, 0)),
                pl.BlockSpec((1, h), lambda i: (0, 0)),
            ],
            out_specs=pl.BlockSpec((rt, h), lambda i: (i, 0)),
        ),
        compiler_params=pltpu.CompilerParams(
            dimension_semantics=("parallel",),
        ),
    )(x2d.astype(operand_dtype), w.astype(operand_dtype), bias2d.astype(jnp.float32))
    return out[:rows]


# ----------------------------------------------------------------------------
# Stage 2: lane-dense (Tr, Ta) accumulator, unrolled weighted-tanh over H
# ----------------------------------------------------------------------------
def _coattention_kernel(keys_ref, qt_ref, a_ref, out_ref, *, h_dim, tanh_dtype):
    keys = keys_ref[0]                    # (Tr, H), bias already folded in
    qt = qt_ref[0]                        # (H, Ta), Ta lane-dense

    acc = jnp.zeros(out_ref.shape[1:], dtype=jnp.float32)   # (Tr, Ta)
    for h in range(h_dim):                # static, fully unrolled
        # (Tr, 1) + (1, Ta) -> (Tr, Ta): full 128-lane occupancy for the
        # EUP-bound tanh; the scale+accumulate are VPU FMAs (free filler).
        e = keys[:, h:h + 1] + qt[h:h + 1, :]
        t = jnp.tanh(e.astype(tanh_dtype))
        acc = acc + a_ref[h] * t.astype(jnp.float32)

    out_ref[0] = acc.astype(out_ref.dtype)


def _choose_tiles(n_r_pad, n_a_pad, batch, *, tr_align=8, tr_cap=256, ta_cap=1024,
                  min_steps=8):
    """Largest divisor tiles (lane-dense Ta, sublane-full Tr) of the minimally
    padded sizes, shrunk only if the grid would be too small for v7x's 2 TCs."""
    def divisors(n, align, cap):
        return [d for d in range(align, min(n, cap) + 1, align) if n % d == 0]

    tr_opts = divisors(n_r_pad, tr_align, tr_cap) or [min(n_r_pad, tr_cap)]
    ta_opts = divisors(n_a_pad, 128, ta_cap) or [min(n_a_pad, ta_cap)]
    ti, ai = len(tr_opts) - 1, len(ta_opts) - 1

    def steps(ti_, ai_):
        return batch * (n_r_pad // tr_opts[ti_]) * (n_a_pad // ta_opts[ai_])

    while steps(ti, ai) < min_steps and (ti > 0 or ai > 0):
        if ai > 0:
            ai -= 1
        else:
            ti -= 1
    return tr_opts[ti], ta_opts[ai]


def coattention(receiver, attendant, w_k, w_q, bias, a, *, tanh_dtype=jnp.float32):
    """scores[b,i,j] = sum_h tanh((receiver@w_k)[b,i,h] + (attendant@w_q)[b,j,h] + bias[h]) * a[h]

    tanh_dtype: jnp.float32 (exact; use on v5e) or jnp.bfloat16 (bf16 EUP /
    bf16 MXU operands / bf16 stage-1 outputs: recommended on v6e & v7x).
    """
    B, N_r, F = receiver.shape
    _, N_a, _ = attendant.shape
    H = w_k.shape[1]
    out_dtype = receiver.dtype

    bf16_path = tanh_dtype == jnp.bfloat16
    operand_dtype = jnp.bfloat16 if bf16_path else jnp.float32
    proj_dtype = jnp.bfloat16 if bf16_path else jnp.float32

    bias2d = bias.reshape(1, H).astype(jnp.float32)
    zeros2d = jnp.zeros((1, H), jnp.float32)
    a1d = a.reshape(H).astype(jnp.float32)

    # ---- stage 1: big fused projections (bias folded into keys) ------------
    keys = _project(receiver.reshape(B * N_r, F), w_k, bias2d,
                    operand_dtype=operand_dtype, out_dtype=proj_dtype
                    ).reshape(B, N_r, H)
    queries = _project(attendant.reshape(B * N_a, F), w_q, zeros2d,
                       operand_dtype=operand_dtype, out_dtype=proj_dtype
                       ).reshape(B, N_a, H)

    # ---- stage 2: minimal-alignment padding, queries transposed ------------
    row_align = 8 if jnp.dtype(proj_dtype).itemsize == 4 else 16
    N_r_pad = _round_up(N_r, row_align)
    N_a_pad = _round_up(N_a, 128)
    keys = jnp.pad(keys, ((0, 0), (0, N_r_pad - N_r), (0, 0)))
    queries = jnp.pad(queries, ((0, 0), (0, N_a_pad - N_a), (0, 0)))
    queries_t = jnp.transpose(queries, (0, 2, 1))          # (B, H, N_a_pad)

    Tr, Ta = _choose_tiles(N_r_pad, N_a_pad, B, tr_align=row_align)
    grid = (B, N_r_pad // Tr, N_a_pad // Ta)

    in_esize = jnp.dtype(proj_dtype).itemsize
    out_esize = jnp.dtype(out_dtype).itemsize
    keys_blk = Tr * H * in_esize
    qt_blk = H * Ta * in_esize
    out_blk = Tr * Ta * out_esize
    acc_bytes = Tr * Ta * 4
    vmem_limit = int(min(2 * (keys_blk + qt_blk + out_blk) + acc_bytes + (8 << 20),
                         32 << 20))

    cost = pl.CostEstimate(
        flops=int(3 * B * N_r_pad * N_a_pad * H),
        transcendentals=int(B * N_r_pad * N_a_pad * H),
        bytes_accessed=int(
            B * N_r_pad * H * in_esize                           # keys (1 fetch per (b,i))
            + B * (N_r_pad // Tr) * N_a_pad * H * in_esize       # queries_t re-read per i
            + B * N_r_pad * N_a_pad * out_esize                  # scores writeback
        ),
    )

    out = pl.pallas_call(
        functools.partial(_coattention_kernel, h_dim=H, tanh_dtype=tanh_dtype),
        out_shape=jax.ShapeDtypeStruct((B, N_r_pad, N_a_pad), out_dtype),
        grid_spec=pltpu.PrefetchScalarGridSpec(
            num_scalar_prefetch=0,
            grid=grid,
            in_specs=[
                pl.BlockSpec((1, Tr, H), lambda b, i, j: (b, i, 0)),
                pl.BlockSpec((1, H, Ta), lambda b, i, j: (b, 0, j)),
                pl.BlockSpec(memory_space=pltpu.MemorySpace.SMEM),   # a[h] scalars
            ],
            out_specs=pl.BlockSpec((1, Tr, Ta), lambda b, i, j: (b, i, j)),
        ),
        compiler_params=pltpu.CompilerParams(
            dimension_semantics=("parallel", "parallel", "parallel"),
            vmem_limit_bytes=vmem_limit,
        ),
        cost_estimate=cost,
    )(keys, queries_t, a1d)

    return out[:, :N_r, :N_a]


# ----------------------------------------------------------------------------
# Pure-JAX reference + deterministic init
# ----------------------------------------------------------------------------
def coattention_ref(receiver, attendant, w_k, w_q, bias, a):
    keys = receiver @ w_k
    queries = attendant @ w_q
    e_act = queries[..., None, :, :] + keys[..., :, None, :] + bias
    return jnp.tanh(e_act) @ a


def xavier_uniform(key, shape, fan_in, fan_out, dtype=jnp.float32):
    bound = math.sqrt(6.0 / (fan_in + fan_out))
    return jax.random.uniform(key, shape, dtype=dtype, minval=-bound, maxval=bound)


if __name__ == "__main__":
    # Small deterministic shapes consistent with the module.
    B, N_r, N_a = 2, 8, 8
    F = 64               # n_features
    H = F // 2           # n_features // 2

    key = jax.random.PRNGKey(0)
    k_wq, k_wk, k_b, k_a, k_r, k_at = jax.random.split(key, 6)

    w_q = xavier_uniform(k_wq, (F, H), fan_in=H, fan_out=F)
    w_k = xavier_uniform(k_wk, (F, H), fan_in=H, fan_out=F)
    bias = xavier_uniform(k_b, (H,), fan_in=1, fan_out=H)
    a = xavier_uniform(k_a, (H,), fan_in=1, fan_out=H)

    receiver = jax.random.normal(k_r, (B, N_r, F), dtype=jnp.float32)
    attendant = jax.random.normal(k_at, (B, N_a, F), dtype=jnp.float32)

    ref = coattention_ref(receiver, attendant, w_k, w_q, bias, a)

    # f32 path (recommended on v5e).
    out = jax.block_until_ready(coattention(receiver, attendant, w_k, w_q, bias, a))
    assert out.shape == (B, N_r, N_a), out.shape
    assert jnp.allclose(out, ref, atol=1e-2, rtol=1e-2), float(
        jnp.max(jnp.abs(out - ref))
    )

    # bf16 path (recommended on v6e/v7x: bf16 MXU + bf16 EUP).  Looser tolerance.
    out_bf16 = jax.block_until_ready(
        coattention(receiver, attendant, w_k, w_q, bias, a, tanh_dtype=jnp.bfloat16)
    )
    assert out_bf16.shape == (B, N_r, N_a), out_bf16.shape
    assert jnp.allclose(out_bf16, ref, atol=1.5e-1), float(
        jnp.max(jnp.abs(out_bf16 - ref))
    )

    print("KERNEL_OK")
</pallas_src>

<mosaic_0001>
module attributes {stable_mosaic.version = 11 : i64} {
  func.func @_projection_kernel(%arg0: i32, %arg1: memref<16x64xf32, #tpu.memory_space<vmem>>, %arg2: memref<64x32xf32, #tpu.memory_space<vmem>>, %arg3: memref<1x32xf32, #tpu.memory_space<vmem>>, %arg4: memref<16x32xf32, #tpu.memory_space<vmem>>) attributes {dimension_semantics = [#tpu.dimension_semantics<parallel>], iteration_bounds = array<i64: 1>, scalar_prefetch = 0 : i64, scratch_operands = 0 : i64, tpu.core_type = #tpu.core_type<tc>, window_params = [{transform_indices = @transform_0, window_bounds = array<i64: 16, 64>}, {pipeline_mode = #tpu.pipeline_mode<synchronous>, transform_indices = @transform_1, window_bounds = array<i64: 64, 32>}, {pipeline_mode = #tpu.pipeline_mode<synchronous>, transform_indices = @transform_2, window_bounds = array<i64: 1, 32>}, {transform_indices = @transform_3, window_bounds = array<i64: 16, 32>}]} {
    %c0 = arith.constant 0 : index
    %c0_0 = arith.constant 0 : index
    %0 = vector.load %arg1[%c0, %c0_0] : memref<16x64xf32, #tpu.memory_space<vmem>>, vector<16x64xf32>
    %c0_1 = arith.constant 0 : index
    %c0_2 = arith.constant 0 : index
    %1 = vector.load %arg2[%c0_1, %c0_2] : memref<64x32xf32, #tpu.memory_space<vmem>>, vector<64x32xf32>
    %cst = arith.constant dense<0.000000e+00> : vector<16x32xf32>
    %2 = tpu.matmul %0, %1, %cst {dimension_numbers = #tpu.dot_dimension_numbers<[1], [0], [0], [1], [0, 0, 1, 1], [], []>} : vector<16x64xf32>, vector<64x32xf32>, vector<16x32xf32> -> vector<16x32xf32>
    %c0_3 = arith.constant 0 : index
    %c0_4 = arith.constant 0 : index
    %3 = vector.load %arg3[%c0_3, %c0_4] : memref<1x32xf32, #tpu.memory_space<vmem>>, vector<1x32xf32>
    %4 = vector.broadcast %3 : vector<1x32xf32> to vector<16x32xf32>
    %5 = arith.addf %2, %4 : vector<16x32xf32>
    %c0_5 = arith.constant 0 : index
    %c0_6 = arith.constant 0 : index
    %6 = vector.load %arg4[%c0_5, %c0_6] : memref<16x32xf32, #tpu.memory_space<vmem>>, vector<16x32xf32>
    tpu.vector_store %arg4[%c0_5, %c0_6], %5 {strides = array<i32>} : memref<16x32xf32, #tpu.memory_space<vmem>>, vector<16x32xf32>,
    return
  }
  func.func @transform_0(%arg0: i32) -> (i32, i32) {
    %c0_i32 = arith.constant 0 : i32
    %c0_i32_0 = arith.constant 0 : i32
    return %arg0, %c0_i32 : i32, i32
  }
  func.func @transform_1(%arg0: i32) -> (i32, i32) {
    %c0_i32 = arith.constant 0 : i32
    %c0_i32_0 = arith.constant 0 : i32
    %c0_i32_1 = arith.constant 0 : i32
    return %c0_i32, %c0_i32_0 : i32, i32
  }
  func.func @transform_2(%arg0: i32) -> (i32, i32) {
    %c0_i32 = arith.constant 0 : i32
    %c0_i32_0 = arith.constant 0 : i32
    %c0_i32_1 = arith.constant 0 : i32
    return %c0_i32, %c0_i32_0 : i32, i32
  }
  func.func @transform_3(%arg0: i32) -> (i32, i32) {
    %c0_i32 = arith.constant 0 : i32
    %c0_i32_0 = arith.constant 0 : i32
    return %arg0, %c0_i32 : i32, i32
  }
}

</mosaic_0001>

<bundles_post_ra>
// kernel: tpu_custom_call.1
= control target key start
LH: loop header
LB: loop body
LE: loop exit
PB: predicated region body
PF: predicated region fallthrough
CT: control target
= control target key end

     0   :  { %s179_s0 = inlined_call_operand.vmem [shape: f32[16,64], index: 0, kind: input, shape index: {}]   ;;  %s180_s1 = inlined_call_operand.vmem [shape: f32[64,32], index: 1, kind: input, shape index: {}]   ;;  %s181_s2 = inlined_call_operand.vmem [shape: f32[1,32], index: 2, kind: input, shape index: {}]   ;;  %s182_s3 = inlined_call_operand.hbm [shape: f32[16,32], index: 3, kind: output, shape index: {}]  }
   0x1   :  { %v24_v0 = vld [vmem:[%s180_s1 + $0x38] sm:$0xff]  ;;  %v23_v1 = vld [vmem:[%s180_s1 + $0x30] sm:$0xff]  ;;  %v22_v2 = vld [vmem:[%s180_s1 + $0x28] sm:$0xff] }
   0x2   :  { %44 = vmatpush.msra.mxu0 %v24_v0  ;;  %82 = vmatpush.msra.mxu1 %v24_v0  ;;  %v21_v3 = vld [vmem:[%s180_s1 + $0x20] sm:$0xff] }
   0x4   :  { %45 = vmatpush.msra.mxu0 %v23_v1  ;;  %83 = vmatpush.msra.mxu1 %v23_v1 }
   0x5   :  { %8 = vsyncpa [#allocation3], 0  ;;  %v20_v4 = vld [vmem:[%s180_s1 + $0x18] sm:$0xff]  ;;  %v19_v5 = vld [vmem:[%s180_s1 + $0x10] sm:$0xff]  ;;  %vm29_vm0 = vcmask 523264   ;;  %s68_s10 = sshll.u32 %s182_s3, 4  ;;  %s69_s10 = int_to_ptr.hbm [resolvable:$true] %s68_s10 }
   0x6   :  { %46 = vmatpush.msra.mxu0 %v22_v2  ;;  %84 = vmatpush.msra.mxu1 %v22_v2  ;;  %v18_v6 = vld [vmem:[%s180_s1 + $0x8] sm:$0xff]  ;;  %v17_v7 = vld [vmem:[%s180_s1] sm:$0xff]  ;;  %s120_s1 = smov [#allocation2]   ;;  %vm59_vm1 = vcmask 261120   ;;  %s122_s11 = smov 8  }
   0x7   :  { %v15_v8 = vld [vmem:[%s179_s0] sm:$0xff]  ;;  %v16_v9 = vld [vmem:[%s179_s0 + $0x8] sm:$0xff]  ;;  %s66_s7 = sshll.u32 %s120_s1, 4  ;;  %s121_s0 = smov 128   ;;  %s67_s7 = int_to_ptr.vmem [resolvable:$true] %s66_s7 }
   0x8   :  { %47 = vmatpush.msra.mxu0 %v21_v3  ;;  %85 = vmatpush.msra.mxu1 %v21_v3  ;;  %v93_v10 = vld [vmem:[%s181_s2] ss:$0 sm:$0xff] }
   0xa   :  { %48 = vmatpush.msra.mxu0 %v20_v4  ;;  %86 = vmatpush.msra.mxu1 %v20_v4 }
   0xc   :  { %49 = vmatpush.msra.mxu0 %v19_v5  ;;  %87 = vmatpush.msra.mxu1 %v19_v5 }
   0xe   :  { %50 = vmatpush.msra.mxu0 %v18_v6  ;;  %88 = vmatpush.msra.mxu1 %v18_v6 }
  0x10   :  { %51 = vmatpush.msra.mxu0 %v17_v7  ;;  %89 = vmatpush.msra.mxu1 %v17_v7 }
  0x11   :  { %80 = vmatmul.msk.f32.vlgmr.msra.gmra.mxu0 %vm29_vm0, %v15_v8  ;;  %81 = vmatmul.msk.f32.vlgmr.msra.gmra.mxu1 %vm29_vm0, %v16_v9 }
  0x8e   :  { %v53_v11 = vpop.f32.mrf.mxu0  ;;  %v56_v12 = vpop.f32.mrf.mxu1 }
  0x8f   :  { %v54_v13 = vadd.f32 %v93_v10, %v53_v11  ;;  %v57_v14 = vadd.f32 %v93_v10, %v56_v12 }
  0x91   :  { %60 = vst.msk [vmem:[#allocation2] sm:$0xff] %vm59_vm1, %v54_v13 }
  0x92   :  { %61 = vst.msk [vmem:[#allocation2 + $0x8] sm:$0xff] %vm59_vm1, %v57_v14 }
  0x93   :  { %74 = dma.vmem_to_hbm [thread:$0]  %s67_s7, 256, %s69_s10, [#allocation3], %s121_s0, %s121_s0, %s122_s11  }
  0x94   :  { %118 = dma.done.wait [#allocation3], 256  }
  0x95   :  { %119 = vsyncadd [#allocation3], 4294967040 }
  0x96   :  { %79 = vsyncpa [#allocation3], 1 }

</bundles_post_ra>
